<compile_context>
chip_gen: v7x
topology: tpu7x:2x2x1
jax: 0.10.0
libtpu: 0.0.40
codegen_flags: <defaults>
</compile_context>

<pallas_src>
import math
import functools

import jax
import jax.numpy as jnp
from jax import lax
from jax.experimental import pallas as pl
from jax.experimental.pallas import tpu as pltpu


def _round_up(x, m):
    return ((x + m - 1) // m) * m


def _make_kernel(eps):
    inv_sqrt2 = 1.0 / math.sqrt(2.0)

    def kernel(x_ref, w_ref, b_ref, gamma_ref, beta_ref, o_ref):
        # x_ref: (tm, H)  w_ref: (H, H)  b/gamma/beta: (1, H)  o_ref: (tm, H)
        # MXU matmul in the operands' native dtype (bf16-friendly), f32 accumulate.
        h = jnp.dot(x_ref[...], w_ref[...], preferred_element_type=jnp.float32)
        h = h + b_ref[...].astype(jnp.float32)

        # Exact erf-based GELU (matches the PyTorch reference implementation).
        # TODO(synk): switch to tanh-approx GELU (EUP) if bit-matching PyTorch is not required.
        h = h * 0.5 * (1.0 + lax.erf(h * inv_sqrt2))

        # LayerNorm over hidden dim, single-pass statistics (both reductions are
        # independent, so the two cross-lane reduces can overlap on the XLU).
        inv_h = 1.0 / h.shape[-1]
        s1 = jnp.sum(h, axis=-1, keepdims=True)
        s2 = jnp.sum(h * h, axis=-1, keepdims=True)
        mean = s1 * inv_h
        var = jnp.maximum(s2 * inv_h - mean * mean, 0.0)
        y = (h - mean) * lax.rsqrt(var + eps)
        y = y * gamma_ref[...].astype(jnp.float32) + beta_ref[...].astype(jnp.float32)

        o_ref[...] = y.astype(o_ref.dtype)

    return kernel


def visual_prediction_head_transform(x, w_t, b, gamma, beta, *, eps=1e-12, tile_m=None):
    """x: [B, S, H];  w_t: [H, H] (pre-transposed, y = x @ w_t);  b/gamma/beta: [H].

    Note: for production shapes H should be a multiple of 128 (lane-dense stores);
    BERT hidden_size=768 satisfies this. The H=32 unit-test shape is correctness-only.
    """
    B, S, H = x.shape
    M = B * S
    x2 = x.reshape(M, H)

    # --- row-tile selection: multiple of 8, capped by (padded) M -----------------
    if tile_m is None:
        tile_m = 256
    tile_m = min(_round_up(tile_m, 8), _round_up(M, 8))

    M_pad = _round_up(M, tile_m)
    if M_pad != M:
        # Zero-padded rows produce finite garbage that is sliced off below.
        x2 = jnp.pad(x2, ((0, M_pad - M), (0, 0)))

    b2 = b.reshape(1, H).astype(jnp.float32)
    g2 = gamma.reshape(1, H).astype(jnp.float32)
    be2 = beta.reshape(1, H).astype(jnp.float32)

    # --- VMEM budget & cost estimate ---------------------------------------------
    x_bytes = jnp.dtype(x.dtype).itemsize
    w_bytes = jnp.dtype(w_t.dtype).itemsize
    vmem_needed = (
        2 * tile_m * H * x_bytes        # x tile, double-buffered
        + 2 * tile_m * H * x_bytes      # out tile, double-buffered
        + H * H * w_bytes               # resident weight, single-buffered
        + 3 * H * 4                     # bias / gamma / beta
    )
    vmem_limit = max(32 << 20, min(int(vmem_needed * 3 // 2), 96 << 20))

    cost = pl.CostEstimate(
        flops=2 * M_pad * H * H,
        transcendentals=M_pad * H,  # erf per element
        bytes_accessed=2 * M_pad * H * x_bytes + H * H * w_bytes + 3 * H * 4,
    )

    grid = (M_pad // tile_m,)

    out = pl.pallas_call(
        _make_kernel(eps),
        out_shape=jax.ShapeDtypeStruct((M_pad, H), x.dtype),
        grid=grid,
        in_specs=[
            pl.BlockSpec((tile_m, H), lambda i: (i, 0)),   # x row-tile (pipelined)
            pl.BlockSpec((H, H), lambda i: (0, 0),
                         pipeline_mode=pl.Buffered(1)),    # weight: resident, single buffer
            pl.BlockSpec((1, H), lambda i: (0, 0),
                         pipeline_mode=pl.Buffered(1)),    # bias
            pl.BlockSpec((1, H), lambda i: (0, 0),
                         pipeline_mode=pl.Buffered(1)),    # LN gamma
            pl.BlockSpec((1, H), lambda i: (0, 0),
                         pipeline_mode=pl.Buffered(1)),    # LN beta
        ],
        out_specs=pl.BlockSpec((tile_m, H), lambda i: (i, 0)),
        compiler_params=pltpu.CompilerParams(
            dimension_semantics=("parallel",),
            vmem_limit_bytes=vmem_limit,
        ),
        cost_estimate=cost,
    )(x2, w_t, b2, g2, be2)

    if M_pad != M:
        out = out[:M]
    return out.reshape(B, S, H)


def _reference(x, w_t, b, gamma, beta, eps=1e-12):
    h = jnp.einsum("bsh,hk->bsk", x.astype(jnp.float32), w_t.astype(jnp.float32)) + b
    h = h * 0.5 * (1.0 + lax.erf(h / jnp.sqrt(2.0)))
    mean = jnp.mean(h, axis=-1, keepdims=True)
    var = jnp.mean((h - mean) ** 2, axis=-1, keepdims=True)
    return ((h - mean) * lax.rsqrt(var + eps)) * gamma + beta


if __name__ == "__main__":
    key = jax.random.PRNGKey(0)
    batch, seq, hidden = 2, 8, 32
    eps = 1e-12

    k_x, k_w, k_b, k_g, k_beta = jax.random.split(key, 5)
    x = jax.random.normal(k_x, (batch, seq, hidden), dtype=jnp.float32)

    # nn.Linear(hidden, hidden): weight (out, in), bias (out,). Pre-transpose weight.
    w = jax.random.normal(k_w, (hidden, hidden), dtype=jnp.float32) * (1.0 / math.sqrt(hidden))
    w_t = w.T
    b = jax.random.normal(k_b, (hidden,), dtype=jnp.float32) * 0.02

    # nn.LayerNorm(hidden): gamma ~ ones, beta ~ zeros (slightly perturbed, deterministic).
    gamma = jnp.ones((hidden,), dtype=jnp.float32) + 0.01 * jax.random.normal(k_g, (hidden,), dtype=jnp.float32)
    beta = 0.01 * jax.random.normal(k_beta, (hidden,), dtype=jnp.float32)

    y = visual_prediction_head_transform(x, w_t, b, gamma, beta, eps=eps)
    y = jax.block_until_ready(y)

    y_ref = _reference(x, w_t, b, gamma, beta, eps=eps)
    assert y.shape == (batch, seq, hidden)
    assert jnp.allclose(y, y_ref, atol=2e-5, rtol=2e-5), "mismatch vs JAX reference"

    print("KERNEL_OK")
</pallas_src>

<mosaic_0001>
module attributes {stable_mosaic.version = 11 : i64} {
  func.func @kernel(%arg0: i32, %arg1: memref<16x32xf32, #tpu.memory_space<vmem>>, %arg2: memref<32x32xf32, #tpu.memory_space<vmem>>, %arg3: memref<1x32xf32, #tpu.memory_space<vmem>>, %arg4: memref<1x32xf32, #tpu.memory_space<vmem>>, %arg5: memref<1x32xf32, #tpu.memory_space<vmem>>, %arg6: memref<16x32xf32, #tpu.memory_space<vmem>>) attributes {dimension_semantics = [#tpu.dimension_semantics<parallel>], iteration_bounds = array<i64: 1>, scalar_prefetch = 0 : i64, scratch_operands = 0 : i64, tpu.core_type = #tpu.core_type<tc>, window_params = [{transform_indices = @transform_0, window_bounds = array<i64: 16, 32>}, {pipeline_mode = #tpu.pipeline_mode<synchronous>, transform_indices = @transform_1, window_bounds = array<i64: 32, 32>}, {pipeline_mode = #tpu.pipeline_mode<synchronous>, transform_indices = @transform_2, window_bounds = array<i64: 1, 32>}, {pipeline_mode = #tpu.pipeline_mode<synchronous>, transform_indices = @transform_3, window_bounds = array<i64: 1, 32>}, {pipeline_mode = #tpu.pipeline_mode<synchronous>, transform_indices = @transform_4, window_bounds = array<i64: 1, 32>}, {transform_indices = @transform_5, window_bounds = array<i64: 16, 32>}]} {
    %c0 = arith.constant 0 : index
    %c0_0 = arith.constant 0 : index
    %0 = vector.load %arg1[%c0, %c0_0] : memref<16x32xf32, #tpu.memory_space<vmem>>, vector<16x32xf32>
    %c0_1 = arith.constant 0 : index
    %c0_2 = arith.constant 0 : index
    %1 = vector.load %arg2[%c0_1, %c0_2] : memref<32x32xf32, #tpu.memory_space<vmem>>, vector<32x32xf32>
    %cst = arith.constant dense<0.000000e+00> : vector<16x32xf32>
    %2 = tpu.matmul %0, %1, %cst {dimension_numbers = #tpu.dot_dimension_numbers<[1], [0], [0], [1], [0, 0, 1, 1], [], []>} : vector<16x32xf32>, vector<32x32xf32>, vector<16x32xf32> -> vector<16x32xf32>
    %c0_3 = arith.constant 0 : index
    %c0_4 = arith.constant 0 : index
    %3 = vector.load %arg3[%c0_3, %c0_4] : memref<1x32xf32, #tpu.memory_space<vmem>>, vector<1x32xf32>
    %4 = vector.broadcast %3 : vector<1x32xf32> to vector<16x32xf32>
    %5 = arith.addf %2, %4 : vector<16x32xf32>
    %cst_5 = arith.constant 5.000000e-01 : f32
    %6 = vector.broadcast %cst_5 : f32 to vector<16x32xf32>
    %7 = arith.mulf %5, %6 : vector<16x32xf32>
    %cst_6 = arith.constant 0.707106769 : f32
    %8 = vector.broadcast %cst_6 : f32 to vector<16x32xf32>
    %9 = arith.mulf %5, %8 : vector<16x32xf32>
    %10 = math.erf %9 : vector<16x32xf32>
    %cst_7 = arith.constant 1.000000e+00 : f32
    %11 = vector.broadcast %cst_7 : f32 to vector<16x32xf32>
    %12 = arith.addf %11, %10 : vector<16x32xf32>
    %13 = arith.mulf %7, %12 : vector<16x32xf32>
    %cst_8 = arith.constant dense<0.000000e+00> : vector<16xf32>
    %14 = vector.multi_reduction <add>, %13, %cst_8 [1] : vector<16x32xf32> to vector<16xf32>
    %15 = vector.shape_cast %14 : vector<16xf32> to vector<16x1xf32>
    %16 = arith.mulf %13, %13 : vector<16x32xf32>
    %cst_9 = arith.constant dense<0.000000e+00> : vector<16xf32>
    %17 = vector.multi_reduction <add>, %16, %cst_9 [1] : vector<16x32xf32> to vector<16xf32>
    %18 = vector.shape_cast %17 : vector<16xf32> to vector<16x1xf32>
    %cst_10 = arith.constant 3.125000e-02 : f32
    %19 = vector.broadcast %cst_10 : f32 to vector<16x1xf32>
    %20 = arith.mulf %15, %19 : vector<16x1xf32>
    %cst_11 = arith.constant 3.125000e-02 : f32
    %21 = vector.broadcast %cst_11 : f32 to vector<16x1xf32>
    %22 = arith.mulf %18, %21 : vector<16x1xf32>
    %23 = arith.mulf %20, %20 : vector<16x1xf32>
    %24 = arith.subf %22, %23 : vector<16x1xf32>
    %cst_12 = arith.constant 0.000000e+00 : f32
    %25 = vector.broadcast %cst_12 : f32 to vector<16x1xf32>
    %26 = arith.maximumf %24, %25 : vector<16x1xf32>
    %27 = vector.broadcast %20 : vector<16x1xf32> to vector<16x32xf32>
    %28 = arith.subf %13, %27 : vector<16x32xf32>
    %cst_13 = arith.constant 9.99999996E-13 : f32
    %29 = vector.broadcast %cst_13 : f32 to vector<16x1xf32>
    %30 = arith.addf %26, %29 : vector<16x1xf32>
    %31 = math.rsqrt %30 : vector<16x1xf32>
    %32 = vector.broadcast %31 : vector<16x1xf32> to vector<16x32xf32>
    %33 = arith.mulf %28, %32 : vector<16x32xf32>
    %c0_14 = arith.constant 0 : index
    %c0_15 = arith.constant 0 : index
    %34 = vector.load %arg4[%c0_14, %c0_15] : memref<1x32xf32, #tpu.memory_space<vmem>>, vector<1x32xf32>
    %35 = vector.broadcast %34 : vector<1x32xf32> to vector<16x32xf32>
    %36 = arith.mulf %33, %35 : vector<16x32xf32>
    %c0_16 = arith.constant 0 : index
    %c0_17 = arith.constant 0 : index
    %37 = vector.load %arg5[%c0_16, %c0_17] : memref<1x32xf32, #tpu.memory_space<vmem>>, vector<1x32xf32>
    %38 = vector.broadcast %37 : vector<1x32xf32> to vector<16x32xf32>
    %39 = arith.addf %36, %38 : vector<16x32xf32>
    %c0_18 = arith.constant 0 : index
    %c0_19 = arith.constant 0 : index
    %40 = vector.load %arg6[%c0_18, %c0_19] : memref<16x32xf32, #tpu.memory_space<vmem>>, vector<16x32xf32>
    tpu.vector_store %arg6[%c0_18, %c0_19], %39 {strides = array<i32>} : memref<16x32xf32, #tpu.memory_space<vmem>>, vector<16x32xf32>,
    return
  }
  func.func @transform_0(%arg0: i32) -> (i32, i32) {
    %c0_i32 = arith.constant 0 : i32
    %c0_i32_0 = arith.constant 0 : i32
    return %arg0, %c0_i32 : i32, i32
  }
  func.func @transform_1(%arg0: i32) -> (i32, i32) {
    %c0_i32 = arith.constant 0 : i32
    %c0_i32_0 = arith.constant 0 : i32
    %c0_i32_1 = arith.constant 0 : i32
    return %c0_i32, %c0_i32_0 : i32, i32
  }
  func.func @transform_2(%arg0: i32) -> (i32, i32) {
    %c0_i32 = arith.constant 0 : i32
    %c0_i32_0 = arith.constant 0 : i32
    %c0_i32_1 = arith.constant 0 : i32
    return %c0_i32, %c0_i32_0 : i32, i32
  }
  func.func @transform_3(%arg0: i32) -> (i32, i32) {
    %c0_i32 = arith.constant 0 : i32
    %c0_i32_0 = arith.constant 0 : i32
    %c0_i32_1 = arith.constant 0 : i32
    return %c0_i32, %c0_i32_0 : i32, i32
  }
  func.func @transform_4(%arg0: i32) -> (i32, i32) {
    %c0_i32 = arith.constant 0 : i32
    %c0_i32_0 = arith.constant 0 : i32
    %c0_i32_1 = arith.constant 0 : i32
    return %c0_i32, %c0_i32_0 : i32, i32
  }
  func.func @transform_5(%arg0: i32) -> (i32, i32) {
    %c0_i32 = arith.constant 0 : i32
    %c0_i32_0 = arith.constant 0 : i32
    return %arg0, %c0_i32 : i32, i32
  }
}

</mosaic_0001>

<bundles_post_ra>
// kernel: tpu_custom_call.1
= control target key start
LH: loop header
LB: loop body
LE: loop exit
PB: predicated region body
PF: predicated region fallthrough
CT: control target
= control target key end

     0   :  { %10 = vsyncpa [#allocation3], 0  ;;  %s436_s0 = inlined_call_operand.hbm [shape: f32[16,32], index: 0, kind: input, shape index: {}]   ;;  %s437_s1 = inlined_call_operand.hbm [shape: f32[32,32], index: 1, kind: input, shape index: {}]   ;;  %s438_s2 = inlined_call_operand.vmem [shape: f32[1,32], index: 2, kind: input, shape index: {}]   ;;  %s439_s3 = inlined_call_operand.vmem [shape: f32[1,32], index: 3, kind: input, shape index: {}]   ;;  %s440_s4 = inlined_call_operand.vmem [shape: f32[1,32], index: 4, kind: input, shape index: {}]   ;;  %s441_s5 = inlined_call_operand.hbm [shape: f32[16,32], index: 5, kind: output, shape index: {}]  }
   0x1   :  { %11 = vsyncpa [#allocation6], 0 }
   0x2   :  { %12 = vsyncpa [#allocation4], 0  ;;  %s339_s18 = smov [#allocation2]   ;;  %s267_s22 = scalar_lea.hbm %s436_s0, 256 }
   0x3   :  { %s18_s19 = sshll.u32 %s339_s18, 4  ;;  %p268_p0 = scmp.ne.s32.totalorder %s436_s0, %s267_s22  ;;  %s19_s19 = int_to_ptr.vmem [resolvable:$true] %s18_s19 }
   0x4   :  { %p271_p1 = scmp.lt.u32.totalorder %s267_s22, %s436_s0 }
   0x6   :  { %p273_p2 = pnand %p271_p1, %p268_p0 }
   0x8   :  { %276 = shalt.err (!%p273_p2)
}
   0x9   :  { %s277_s27 = scalar_lea.vmem %s19_s19, 256  ;;  %p282_p4 = scmp.lt.s32.totalorder %s19_s19, %s19_s19 }
   0xa   :  { %p278_p3 = scmp.ne.s32.totalorder %s19_s19, %s277_s27  ;;  %p283_p5 = scmp.lt.s32.totalorder %s277_s27, %s277_s27 }
   0xc   :  { %p284_p6 = por %p283_p5, %p282_p4 }
   0xe   :  { %p285_p7 = pnand %p284_p6, %p278_p3 }
  0x10   :  { %288 = shalt.err (!%p285_p7)
}
  0x11   :  { %s340_s28 = smov 128   ;;  %s341_s29 = smov 8  }
  0x12   :  { %24 = dma.hbm_to_vmem [thread:$0]  %s436_s0, 256, %s19_s19, [#allocation3], %s340_s28, %s340_s28, %s341_s29  }
  0x13   :  { %s342_s7 = smov [#allocation5]   ;;  %s289_s11 = scalar_lea.hbm %s437_s1, 512 }
  0x14   :  { %s30_s8 = sshll.u32 %s342_s7, 4  ;;  %p290_p8 = scmp.ne.s32.totalorder %s437_s1, %s289_s11  ;;  %s31_s8 = int_to_ptr.vmem [resolvable:$true] %s30_s8 }
  0x15   :  { %p293_p9 = scmp.lt.u32.totalorder %s289_s11, %s437_s1 }
  0x17   :  { %p295_p10 = pnand %p293_p9, %p290_p8 }
  0x19   :  { %298 = shalt.err (!%p295_p10)
}
  0x1a   :  { %s299_s16 = scalar_lea.vmem %s31_s8, 512  ;;  %p304_p12 = scmp.lt.s32.totalorder %s31_s8, %s31_s8 }
  0x1b   :  { %p300_p11 = scmp.ne.s32.totalorder %s31_s8, %s299_s16  ;;  %p305_p13 = scmp.lt.s32.totalorder %s299_s16, %s299_s16 }
  0x1d   :  { %p306_p0 = por %p305_p13, %p304_p12 }
  0x1f   :  { %p307_p1 = pnand %p306_p0, %p300_p11 }
  0x21   :  { %310 = shalt.err (!%p307_p1)
}
  0x22   :  { %36 = dma.hbm_to_vmem [thread:$0]  %s437_s1, 512, %s31_s8, [#allocation6], %s340_s28, %s340_s28, %s341_s29  }
  0x23   :  { %333 = dma.done.wait [#allocation3], 256  }
  0x24   :  { %334 = vsyncadd [#allocation3], 4294967040 }
  0x25   :  { %335 = dma.done.wait [#allocation6], 512  }
  0x26   :  { %336 = vsyncadd [#allocation6], 4294966784  ;;  %vm62_vm0 = vcmask 261120   ;;  %v51_v0 = vld [vmem:[#allocation5] sm:$0xff]  ;;  %v52_v1 = vld [vmem:[#allocation5 + $0x8] sm:$0xff]  ;;  %s343_s22 = smov [#allocation7]  }
  0x27   :  { %v53_v2 = vld [vmem:[#allocation5 + $0x10] sm:$0xff]  ;;  %v246_v3 = vpack.c.bf16 %v52_v1, %v51_v0  ;;  %v54_v4 = vld [vmem:[#allocation5 + $0x18] sm:$0xff]  ;;  %s211_s23 = sshll.u32 %s343_s22, 4  ;;  %s212_s23 = int_to_ptr.vmem [resolvable:$true] %s211_s23 }
  0x28   :  { %v49_v5 = vld [vmem:[#allocation2] sm:$0xff]  ;;  %v250_v6 = vpack.c.bf16 %v54_v4, %v53_v2  ;;  %v50_v7 = vld [vmem:[#allocation2 + $0x8] sm:$0xff]  ;;  %p316_p3 = scmp.lt.s32.totalorder %s212_s23, %s212_s23 }
  0x29   :  { %243 = vmatprep.mubr.msk.f32.mxu0 %vm62_vm0, %v49_v5  ;;  %247 = vmatprep.subr.bf16.mxu0 %v246_v3  ;;  %v224_v8 = vld [vmem:[%s438_s2] ss:$0 sm:$0xff] }
  0x2a   :  { %249 = vmatpush3.bf16.msra.mxu0 %v246_v3  ;;  %v227_v47 = vld [vmem:[%s439_s3] ss:$0 sm:$0xff]  ;;  %s311_s3 = scalar_lea.vmem %s212_s23, 256 }
  0x2b   :  { %251 = vmatprep.subr.bf16.mxu0 %v250_v6  ;;  %v228_v49 = vld [vmem:[%s440_s4] ss:$0 sm:$0xff]  ;;  %p312_p2 = scmp.ne.s32.totalorder %s212_s23, %s311_s3  ;;  %p317_p4 = scmp.lt.s32.totalorder %s311_s3, %s311_s3 }
  0x2d   :  { %p318_p5 = por %p317_p4, %p316_p3 }
  0x2e   :  { %253 = vmatpush3.bf16.msra.mxu0 %v250_v6 }
  0x2f   :  { %p319_p6 = pnand %p318_p5, %p312_p2 }
  0x31   :  { %244 = vmatmul.mubr.msk.f32.vlgmr.msra.gmra.mrb[0].mxu0 %vm62_vm0, %v50_v7 }
 0x104   :  { %v245_v9 = vpop.f32.mrb[0].mxu0 }
 0x105   :  { %v141_v10 = vadd.f32 %v245_v9, %v224_v8  ;;  %v135_v11 = vpop.f32.mrb[1].mxu0 }
 0x106   :  { %v136_v12 = vadd.f32 %v224_v8, %v135_v11 }
 0x107   :  { %v147_v13 = vmul.f32 0.70710677, %v141_v10  ;;  %v145_v18 = vmul.f32 0.5, %v141_v10 }
 0x108   :  { %v146_v14 = vmul.f32 0.70710677, %v136_v12  ;;  %v144_v19 = vmul.f32 0.5, %v136_v12 }
 0x109   :  { %259 = verf.f32 %v147_v13 }
 0x10a   :  { %261 = verf.f32 %v146_v14 }
 0x113   :  { %v260_v15 = vpop.eup %259 }
 0x114   :  { %v262_v16 = vpop.eup %261  ;;  %v151_v17 = vadd.f32 1.0, %v260_v15 }
 0x115   :  { %v150_v20 = vadd.f32 1.0, %v262_v16 }
 0x116   :  { %v153_v21 = vmul.f32 %v151_v17, %v145_v18 }
 0x117   :  { %v152_v22 = vmul.f32 %v150_v20, %v144_v19 }
 0x118   :  { %v161_v26 = vmul.f32 %v153_v21, %v153_v21  ;;  %v157_v27 = vsel %vm62_vm0, %v153_v21, 0.0 }
 0x119   :  { %v154_v23 = vsel %vm62_vm0, %v152_v22, 0.0  ;;  %v160_v24 = vmul.f32 %v152_v22, %v152_v22 }
 0x11a   :  { %155 = vadd.xlane.f32.xlu0 %v154_v23  ;;  %v165_v28 = vsel %vm62_vm0, %v161_v26, 0.0 }
 0x11b   :  { %v162_v25 = vsel %vm62_vm0, %v160_v24, 0.0 }
 0x11c   :  { %163 = vadd.xlane.f32.xlu1 %v162_v25 }
 0x11e   :  { %158 = vadd.xlane.f32.xlu0 %v157_v27 }
 0x120   :  { %166 = vadd.xlane.f32.xlu1 %v165_v28 }
 0x1a7   :  { %v156_v29 = vpop.xlane.xlu0 %155 }
 0x1a8   :  { %v168_v30 = vmul.f32 0.03125, %v156_v29 }
 0x1a9   :  { %v164_v31 = vpop.xlane.xlu1 %163 }
 0x1aa   :  { %v172_v32 = vmul.f32 %v168_v30, %v168_v30  ;;  %v170_v33 = vmul.f32 0.03125, %v164_v31  ;;  %v178_v45 = vsub.f32 %v152_v22, %v168_v30 }
 0x1ab   :  { %v159_v34 = vpop.xlane.xlu0 %158 }
 0x1ac   :  { %v174_v35 = vsub.f32 %v170_v33, %v172_v32  ;;  %v169_v36 = vmul.f32 0.03125, %v159_v34 }
 0x1ad   :  { %v167_v37 = vpop.xlane.xlu1 %166 }
 0x1ae   :  { %v176_v38 = vmax.f32 %v174_v35, 0.0  ;;  %v173_v39 = vmul.f32 %v169_v36, %v169_v36  ;;  %v171_v40 = vmul.f32 0.03125, %v167_v37  ;;  %v179_v50 = vsub.f32 %v153_v21, %v169_v36 }
 0x1b0   :  { %v180_v41 = vadd.f32 1e-12, %v176_v38  ;;  %v175_v42 = vsub.f32 %v171_v40, %v173_v39 }
 0x1b2   :  { %263 = vrsqrt.f32 %v180_v41  ;;  %v177_v43 = vmax.f32 %v175_v42, 0.0 }
 0x1b4   :  { %v181_v44 = vadd.f32 1e-12, %v177_v43 }
 0x1b6   :  { %265 = vrsqrt.f32 %v181_v44 }
 0x1bc   :  { %v264_v46 = vpop.eup %263 }
 0x1bd   :  { %v184_v48 = vmul.f32 %v264_v46, %v178_v45 }
 0x1bf   :  { %v193_v51 = vmul.f32 %v227_v47, %v184_v48 }
 0x1c0   :  { %v266_v52 = vpop.eup %265 }
 0x1c1   :  { %v185_v53 = vmul.f32 %v266_v52, %v179_v50  ;;  %v202_v54 = vadd.f32 %v228_v49, %v193_v51 }
 0x1c3   :  { %v194_v55 = vmul.f32 %v227_v47, %v185_v53  ;;  %204 = vst.msk [vmem:[#allocation7] sm:$0xff] %vm62_vm0, %v202_v54 }
 0x1c5   :  { %v203_v56 = vadd.f32 %v228_v49, %v194_v55 }
 0x1c7   :  { %205 = vst.msk [vmem:[#allocation7 + $0x8] sm:$0xff] %vm62_vm0, %v203_v56 }
 0x1c8   :  { %322 = shalt.err (!%p319_p6)
}
 0x1c9   :  { %s323_s25 = scalar_lea.hbm %s441_s5, 256 }
 0x1ca   :  { %p324_p7 = scmp.ne.s32.totalorder %s441_s5, %s323_s25  ;;  %p327_p8 = scmp.lt.u32.totalorder %s323_s25, %s441_s5 }
 0x1cc   :  { %p329_p9 = pnand %p327_p8, %p324_p7 }
 0x1ce   :  { %332 = shalt.err (!%p329_p9)
}
 0x1cf   :  { %217 = dma.vmem_to_hbm [thread:$0]  %s212_s23, 256, %s441_s5, [#allocation4], %s340_s28, %s340_s28, %s341_s29  }
 0x1d0   :  { %337 = dma.done.wait [#allocation4], 256  }
 0x1d1   :  { %338 = vsyncadd [#allocation4], 4294967040 }
 0x1d2   :  { %221 = vsyncpa [#allocation3], 1 }
 0x1d3   :  { %222 = vsyncpa [#allocation6], 1 }
 0x1d4   :  { %223 = vsyncpa [#allocation4], 1 }

</bundles_post_ra>
